<compile_context>
chip_gen: v7x
topology: tpu7x:2x2x1
jax: 0.10.0
libtpu: 0.0.40
codegen_flags: <defaults>
</compile_context>

<pallas_src>
import functools

import jax
import jax.numpy as jnp
from jax import lax
from jax.experimental import pallas as pl
from jax.experimental.pallas import tpu as pltpu

_LANE = 128
_SUBLANE = 8
_MAX_TILE_ROWS = 512  # 256 KiB per f32 input block; safe on v5e/v6e/v7x VMEM.


def _round_up(x, m):
    return (x + m - 1) // m * m


def _dice_partial_kernel(p_ref, t_ref, inter_ref, den_ref, *,
                         tile_rows, total_rows, need_mask):
    p = p_ref[...].astype(jnp.float32)
    t = t_ref[...].astype(jnp.float32)

    if need_mask:
        # The last grid step's block overruns the (rows, 128) view; rows past
        # the end contain undefined data, so zero them before accumulating.
        i = pl.program_id(0)
        row_ids = i * tile_rows + lax.broadcasted_iota(
            jnp.int32, (tile_rows, _LANE), 0)
        valid = row_ids < total_rows
        p = jnp.where(valid, p, 0.0)
        t = jnp.where(valid, t, 0.0)

    inter = p * t
    den = p * p + t * t

    # (tile_rows, 128) -> (tile_rows//8, 8, 128) groups whole (8,128) vreg
    # tiles, so the reshape is layout-preserving; the axis-0 sum is pure VPU
    # vadds (no cross-lane/sublane XLU work in the steady-state loop).
    g = tile_rows // _SUBLANE
    inter_part = jnp.sum(inter.reshape(g, _SUBLANE, _LANE), axis=0)
    den_part = jnp.sum(den.reshape(g, _SUBLANE, _LANE), axis=0)

    inter_ref[...] = inter_part.reshape(1, _SUBLANE, _LANE)
    den_ref[...] = den_part.reshape(1, _SUBLANE, _LANE)


def binary_dice_loss(predict, target, smooth: float = 0.0):
    """Pallas TPU implementation of BinaryDiceLoss.forward.

    predict, target: arrays of identical shape (any rank; NCHW expected).
    Returns a scalar float32 loss.
    """
    assert predict.shape == target.shape, "predict/target shape mismatch"

    p = predict.reshape(-1)
    t = target.reshape(-1)
    n = p.shape[0]

    # The (rows, 128) lane-dense view needs n % 128 == 0.  Only the (rare)
    # lane tail is zero-padded; zeros contribute nothing to any of the sums.
    # TODO(synk): a manual-DMA tail would avoid this full-array copy when
    # n % 128 != 0; typical NCHW inputs already satisfy n % 128 == 0.
    lane_pad = (-n) % _LANE
    if lane_pad:
        p = jnp.pad(p, (0, lane_pad))
        t = jnp.pad(t, (0, lane_pad))
    rows = (n + lane_pad) // _LANE

    p2 = p.reshape(rows, _LANE)
    t2 = t.reshape(rows, _LANE)

    # Fixed large tile; the ragged last block is masked in-kernel (no row pad,
    # no divisor search).
    tile_rows = min(_MAX_TILE_ROWS, _round_up(rows, _SUBLANE))
    grid_size = pl.cdiv(rows, tile_rows)
    need_mask = (rows % tile_rows) != 0

    kernel = functools.partial(
        _dice_partial_kernel,
        tile_rows=tile_rows,
        total_rows=rows,
        need_mask=need_mask,
    )

    inter_parts, den_parts = pl.pallas_call(
        kernel,
        out_shape=(
            jax.ShapeDtypeStruct((grid_size, _SUBLANE, _LANE), jnp.float32),
            jax.ShapeDtypeStruct((grid_size, _SUBLANE, _LANE), jnp.float32),
        ),
        grid_spec=pltpu.PrefetchScalarGridSpec(
            num_scalar_prefetch=0,
            grid=(grid_size,),
            in_specs=[
                pl.BlockSpec((tile_rows, _LANE), lambda i: (i, 0)),
                pl.BlockSpec((tile_rows, _LANE), lambda i: (i, 0)),
            ],
            out_specs=(
                pl.BlockSpec((1, _SUBLANE, _LANE), lambda i: (i, 0, 0)),
                pl.BlockSpec((1, _SUBLANE, _LANE), lambda i: (i, 0, 0)),
            ),
        ),
        compiler_params=pltpu.CompilerParams(
            dimension_semantics=("parallel",),
        ),
    )(p2, t2)

    # Stage 2: tiny final combine (grid_size * 1024 f32 each) + loss formula.
    intersection = jnp.sum(inter_parts, dtype=jnp.float32)
    den = jnp.sum(den_parts, dtype=jnp.float32)
    smooth = jnp.float32(smooth)
    return 1.0 - (2.0 * intersection + smooth) / (den + smooth)


def _reference(predict, target, smooth=0.0):
    predict = predict.astype(jnp.float32)
    target = target.astype(jnp.float32)
    intersection = jnp.sum(predict * target)
    den = jnp.sum(predict * predict) + jnp.sum(target * target)
    return 1.0 - (2.0 * intersection + smooth) / (den + smooth)


if __name__ == "__main__":
    key = jax.random.PRNGKey(0)
    k1, k2, k3, k4 = jax.random.split(key, 4)

    smooth = 1.0  # BinaryDiceLoss(smooth=1)

    # Primary case: small NCHW binary-segmentation-shaped inputs.
    shape = (2, 4, 16, 16)
    predict = jax.nn.sigmoid(jax.random.normal(k1, shape, dtype=jnp.float32))
    target = (jax.random.uniform(k2, shape) > 0.5).astype(jnp.float32)

    loss = binary_dice_loss(predict, target, smooth=smooth)
    loss = jax.block_until_ready(loss)
    ref = _reference(predict, target, smooth=smooth)
    assert jnp.allclose(loss, ref, atol=1e-5, rtol=1e-5), (loss, ref)

    # Secondary case: exercises the fixed-tile path with a ragged last block
    # (rows = 700 > 512-row tile, 700 % 512 != 0 -> in-kernel masking).
    shape2 = (7, 100, 128)
    predict2 = jax.nn.sigmoid(jax.random.normal(k3, shape2, dtype=jnp.float32))
    target2 = (jax.random.uniform(k4, shape2) > 0.5).astype(jnp.float32)

    loss2 = binary_dice_loss(predict2, target2, smooth=smooth)
    loss2 = jax.block_until_ready(loss2)
    ref2 = _reference(predict2, target2, smooth=smooth)
    assert jnp.allclose(loss2, ref2, atol=1e-5, rtol=1e-5), (loss2, ref2)

    print("KERNEL_OK")
</pallas_src>

<mosaic_0001>
module attributes {stable_mosaic.version = 11 : i64} {
  func.func @_dice_partial_kernel(%arg0: i32, %arg1: memref<16x128xf32, #tpu.memory_space<vmem>>, %arg2: memref<16x128xf32, #tpu.memory_space<vmem>>, %arg3: memref<1x8x128xf32, #tpu.memory_space<vmem>>, %arg4: memref<1x8x128xf32, #tpu.memory_space<vmem>>) attributes {dimension_semantics = [#tpu.dimension_semantics<parallel>], iteration_bounds = array<i64: 1>, scalar_prefetch = 0 : i64, scratch_operands = 0 : i64, tpu.core_type = #tpu.core_type<tc>, window_params = [{transform_indices = @transform_0, window_bounds = array<i64: 16, 128>}, {transform_indices = @transform_1, window_bounds = array<i64: 16, 128>}, {transform_indices = @transform_2, window_bounds = array<i64: 1, 8, 128>}, {transform_indices = @transform_3, window_bounds = array<i64: 1, 8, 128>}]} {
    %c0 = arith.constant 0 : index
    %c0_0 = arith.constant 0 : index
    %0 = vector.load %arg1[%c0, %c0_0] : memref<16x128xf32, #tpu.memory_space<vmem>>, vector<16x128xf32>
    %c0_1 = arith.constant 0 : index
    %c0_2 = arith.constant 0 : index
    %1 = vector.load %arg2[%c0_1, %c0_2] : memref<16x128xf32, #tpu.memory_space<vmem>>, vector<16x128xf32>
    %2 = arith.mulf %0, %1 : vector<16x128xf32>
    %3 = arith.mulf %0, %0 : vector<16x128xf32>
    %4 = arith.mulf %1, %1 : vector<16x128xf32>
    %5 = arith.addf %3, %4 : vector<16x128xf32>
    %6 = vector.shape_cast %2 : vector<16x128xf32> to vector<2x8x128xf32>
    %cst = arith.constant dense<0.000000e+00> : vector<8x128xf32>
    %7 = vector.multi_reduction <add>, %6, %cst [0] : vector<2x8x128xf32> to vector<8x128xf32>
    %8 = vector.shape_cast %5 : vector<16x128xf32> to vector<2x8x128xf32>
    %cst_3 = arith.constant dense<0.000000e+00> : vector<8x128xf32>
    %9 = vector.multi_reduction <add>, %8, %cst_3 [0] : vector<2x8x128xf32> to vector<8x128xf32>
    %10 = vector.shape_cast %7 : vector<8x128xf32> to vector<1x8x128xf32>
    %c0_4 = arith.constant 0 : index
    %c0_5 = arith.constant 0 : index
    %c0_6 = arith.constant 0 : index
    %11 = vector.load %arg3[%c0_4, %c0_5, %c0_6] : memref<1x8x128xf32, #tpu.memory_space<vmem>>, vector<1x8x128xf32>
    tpu.vector_store %arg3[%c0_4, %c0_5, %c0_6], %10 {strides = array<i32>} : memref<1x8x128xf32, #tpu.memory_space<vmem>>, vector<1x8x128xf32>,
    %12 = vector.shape_cast %9 : vector<8x128xf32> to vector<1x8x128xf32>
    %c0_7 = arith.constant 0 : index
    %c0_8 = arith.constant 0 : index
    %c0_9 = arith.constant 0 : index
    %13 = vector.load %arg4[%c0_7, %c0_8, %c0_9] : memref<1x8x128xf32, #tpu.memory_space<vmem>>, vector<1x8x128xf32>
    tpu.vector_store %arg4[%c0_7, %c0_8, %c0_9], %12 {strides = array<i32>} : memref<1x8x128xf32, #tpu.memory_space<vmem>>, vector<1x8x128xf32>,
    return
  }
  func.func @transform_0(%arg0: i32) -> (i32, i32) {
    %c0_i32 = arith.constant 0 : i32
    %c0_i32_0 = arith.constant 0 : i32
    return %arg0, %c0_i32 : i32, i32
  }
  func.func @transform_1(%arg0: i32) -> (i32, i32) {
    %c0_i32 = arith.constant 0 : i32
    %c0_i32_0 = arith.constant 0 : i32
    return %arg0, %c0_i32 : i32, i32
  }
  func.func @transform_2(%arg0: i32) -> (i32, i32, i32) {
    %c0_i32 = arith.constant 0 : i32
    %c0_i32_0 = arith.constant 0 : i32
    %c0_i32_1 = arith.constant 0 : i32
    return %arg0, %c0_i32, %c0_i32_0 : i32, i32, i32
  }
  func.func @transform_3(%arg0: i32) -> (i32, i32, i32) {
    %c0_i32 = arith.constant 0 : i32
    %c0_i32_0 = arith.constant 0 : i32
    %c0_i32_1 = arith.constant 0 : i32
    return %arg0, %c0_i32, %c0_i32_0 : i32, i32, i32
  }
}

</mosaic_0001>

<bundles_post_ra>
// kernel: tpu_custom_call.1
= control target key start
LH: loop header
LB: loop body
LE: loop exit
PB: predicated region body
PF: predicated region fallthrough
CT: control target
= control target key end

     0   :  { %9 = vsyncpa [#allocation3], 0  ;;  %s265_s0 = inlined_call_operand.hbm [shape: f32[16,128], index: 0, kind: input, shape index: {}]   ;;  %s266_s1 = inlined_call_operand.hbm [shape: f32[16,128], index: 1, kind: input, shape index: {}]   ;;  %s267_s2 = inlined_call_operand.hbm [shape: f32[1,8,128], index: 2, kind: output, shape index: {0}]   ;;  %s268_s3 = inlined_call_operand.hbm [shape: f32[1,8,128], index: 3, kind: output, shape index: {1}]  }
   0x1   :  { %10 = vsyncpa [#allocation6], 0 }
   0x2   :  { %11 = vsyncpa [#allocation4], 0 }
   0x3   :  { %12 = vsyncpa [#allocation9], 0  ;;  %s191_s12 = smov [#allocation2]   ;;  %s95_s16 = scalar_lea.hbm %s265_s0, 256 }
   0x4   :  { %s18_s13 = sshll.u32 %s191_s12, 4  ;;  %p96_p0 = scmp.ne.s32.totalorder %s265_s0, %s95_s16  ;;  %s19_s13 = int_to_ptr.vmem [resolvable:$true] %s18_s13 }
   0x5   :  { %p99_p1 = scmp.lt.u32.totalorder %s95_s16, %s265_s0 }
   0x7   :  { %p101_p2 = pnand %p99_p1, %p96_p0 }
   0x9   :  { %104 = shalt.err (!%p101_p2)
}
   0xa   :  { %s105_s21 = scalar_lea.vmem %s19_s13, 256  ;;  %p110_p4 = scmp.lt.s32.totalorder %s19_s13, %s19_s13 }
   0xb   :  { %p106_p3 = scmp.ne.s32.totalorder %s19_s13, %s105_s21  ;;  %p111_p5 = scmp.lt.s32.totalorder %s105_s21, %s105_s21 }
   0xd   :  { %p112_p6 = por %p111_p5, %p110_p4 }
   0xf   :  { %p113_p7 = pnand %p112_p6, %p106_p3 }
  0x11   :  { %116 = shalt.err (!%p113_p7)
}
  0x12   :  { %s192_s22 = smov 128   ;;  %s193_s23 = smov 8  }
  0x13   :  { %24 = dma.hbm_to_vmem [thread:$0]  %s265_s0, 256, %s19_s13, [#allocation3], %s192_s22, %s192_s22, %s193_s23  }
  0x14   :  { %s194_s26 = smov [#allocation5]   ;;  %s117_s30 = scalar_lea.hbm %s266_s1, 256 }
  0x15   :  { %s30_s27 = sshll.u32 %s194_s26, 4  ;;  %p118_p8 = scmp.ne.s32.totalorder %s266_s1, %s117_s30  ;;  %s31_s27 = int_to_ptr.vmem [resolvable:$true] %s30_s27 }
  0x16   :  { %p121_p9 = scmp.lt.u32.totalorder %s117_s30, %s266_s1 }
  0x18   :  { %p123_p10 = pnand %p121_p9, %p118_p8 }
  0x1a   :  { %126 = shalt.err (!%p123_p10)
}
  0x1b   :  { %s127_s8 = scalar_lea.vmem %s31_s27, 256  ;;  %p132_p12 = scmp.lt.s32.totalorder %s31_s27, %s31_s27 }
  0x1c   :  { %p128_p11 = scmp.ne.s32.totalorder %s31_s27, %s127_s8  ;;  %p133_p13 = scmp.lt.s32.totalorder %s127_s8, %s127_s8 }
  0x1e   :  { %p134_p0 = por %p133_p13, %p132_p12 }
  0x20   :  { %p135_p1 = pnand %p134_p0, %p128_p11 }
  0x22   :  { %138 = shalt.err (!%p135_p1)
}
  0x23   :  { %36 = dma.hbm_to_vmem [thread:$0]  %s266_s1, 256, %s31_s27, [#allocation6], %s192_s22, %s192_s22, %s193_s23  }
  0x24   :  { %183 = dma.done.wait [#allocation3], 256  }
  0x25   :  { %184 = vsyncadd [#allocation3], 4294967040 }
  0x26   :  { %185 = dma.done.wait [#allocation6], 256  }
  0x27   :  { %186 = vsyncadd [#allocation6], 4294967040  ;;  %v43_v0 = vld [vmem:[#allocation2] sm:$0xff]  ;;  %v44_v1 = vld [vmem:[#allocation2 + $0x8] sm:$0xff]  ;;  %s195_s10 = smov [#allocation7]   ;;  %s196_s12 = smov [#allocation8]  }
  0x28   :  { %v45_v2 = vld [vmem:[#allocation5] sm:$0xff]  ;;  %v46_v3 = vld [vmem:[#allocation5 + $0x8] sm:$0xff]  ;;  %v49_v5 = vmul.f32 %v43_v0, %v43_v0  ;;  %v50_v6 = vmul.f32 %v44_v1, %v44_v1  ;;  %s65_s11 = sshll.u32 %s195_s10, 4  ;;  %s75_s13 = sshll.u32 %s196_s12, 4  ;;  %s66_s11 = int_to_ptr.vmem [resolvable:$true] %s65_s11  ;;  %s76_s13 = int_to_ptr.vmem [resolvable:$true] %s75_s13 }
  0x29   :  { %v47_v4 = vmul.f32 %v45_v2, %v43_v0  ;;  %v51_v7 = vmul.f32 %v45_v2, %v45_v2  ;;  %v48_v8 = vmul.f32 %v46_v3, %v44_v1  ;;  %v52_v9 = vmul.f32 %v46_v3, %v46_v3  ;;  %s139_s1 = scalar_lea.vmem %s66_s11, 128  ;;  %p144_p3 = scmp.lt.s32.totalorder %s66_s11, %s66_s11 }
  0x2a   :  { %p140_p2 = scmp.ne.s32.totalorder %s66_s11, %s139_s1  ;;  %p145_p4 = scmp.lt.s32.totalorder %s139_s1, %s139_s1 }
  0x2b   :  { %v53_v10 = vadd.f32 %v51_v7, %v49_v5  ;;  %v55_v11 = vadd.f32 %v48_v8, %v47_v4  ;;  %v54_v12 = vadd.f32 %v52_v9, %v50_v6 }
  0x2c   :  { %p146_p5 = por %p145_p4, %p144_p3 }
  0x2d   :  { %57 = vst [vmem:[#allocation7] sm:$0xff] %v55_v11  ;;  %v56_v13 = vadd.f32 %v54_v12, %v53_v10 }
  0x2e   :  { %p147_p6 = pnand %p146_p5, %p140_p2 }
  0x30   :  { %150 = shalt.err (!%p147_p6)
}
  0x31   :  { %s151_s16 = scalar_lea.hbm %s267_s2, 128 }
  0x32   :  { %p152_p7 = scmp.ne.s32.totalorder %s267_s2, %s151_s16  ;;  %p155_p8 = scmp.lt.u32.totalorder %s151_s16, %s267_s2 }
  0x34   :  { %p157_p9 = pnand %p155_p8, %p152_p7 }
  0x36   :  { %160 = shalt.err (!%p157_p9)
}
  0x37   :  { %68 = dma.vmem_to_hbm [thread:$0]  %s66_s11, 128, %s267_s2, [#allocation4]   ;;  %58 = vst [vmem:[#allocation8] sm:$0xff] %v56_v13 }
  0x38   :  { %s161_s23 = scalar_lea.vmem %s76_s13, 128  ;;  %p166_p11 = scmp.lt.s32.totalorder %s76_s13, %s76_s13 }
  0x39   :  { %p162_p10 = scmp.ne.s32.totalorder %s76_s13, %s161_s23  ;;  %p167_p12 = scmp.lt.s32.totalorder %s161_s23, %s161_s23 }
  0x3b   :  { %p168_p13 = por %p167_p12, %p166_p11 }
  0x3d   :  { %p169_p0 = pnand %p168_p13, %p162_p10 }
  0x3f   :  { %172 = shalt.err (!%p169_p0)
}
  0x40   :  { %s173_s26 = scalar_lea.hbm %s268_s3, 128 }
  0x41   :  { %p174_p1 = scmp.ne.s32.totalorder %s268_s3, %s173_s26  ;;  %p177_p2 = scmp.lt.u32.totalorder %s173_s26, %s268_s3 }
  0x43   :  { %p179_p3 = pnand %p177_p2, %p174_p1 }
  0x45   :  { %182 = shalt.err (!%p179_p3)
}
  0x46   :  { %78 = dma.vmem_to_hbm [thread:$0]  %s76_s13, 128, %s268_s3, [#allocation9]  }
  0x47   :  { %187 = dma.done.wait [#allocation4], 128  }
  0x48   :  { %188 = vsyncadd [#allocation4], 4294967168 }
  0x49   :  { %189 = dma.done.wait [#allocation9], 128  }
  0x4a   :  { %190 = vsyncadd [#allocation9], 4294967168 }
  0x4b   :  { %85 = vsyncpa [#allocation3], 1 }
  0x4c   :  { %86 = vsyncpa [#allocation6], 1 }
  0x4d   :  { %87 = vsyncpa [#allocation4], 1 }
  0x4e   :  { %88 = vsyncpa [#allocation9], 1 }

</bundles_post_ra>
